<compile_context>
chip_gen: v6e
topology: v6e:2x2x1
jax: 0.10.0
libtpu: 0.0.40
codegen_flags: <defaults>
</compile_context>

<pallas_src>
import jax
import jax.numpy as jnp
from jax import lax
from jax.experimental import pallas as pl
from jax.experimental.pallas import tpu as pltpu

EPS = 1e-5


# ---------------------------------------------------------------------------
# Pass 1: conv1 (1x1)  ->  raw activation + per-tile BN partial stats.
# ---------------------------------------------------------------------------
def conv1x1_stats_kernel(x_ref, w_ref, y_ref, st_ref):
    _, H, W, Cin = x_ref.shape
    M = H * W
    x = x_ref[0].reshape(M, Cin).astype(jnp.bfloat16)
    y = jnp.dot(x, w_ref[...], preferred_element_type=jnp.float32)
    y_ref[0] = y.reshape(H, W, y.shape[-1])
    s = jnp.sum(y, axis=0, keepdims=True)
    ss = jnp.sum(y * y, axis=0, keepdims=True)
    st_ref[0] = jnp.concatenate([s, ss], axis=0)


# ---------------------------------------------------------------------------
# Pass 2: bn1 + relu + conv2 (3x3, stride 1, pad 1)  ->  raw + partial stats.
# conv2 is 9 MXU-accumulated matmuls over bf16 shifted views (no im2col
# temporary, no padded full copy).
# ---------------------------------------------------------------------------
def bn_relu_conv3x3_stats_kernel(y1_ref, sc_ref, sh_ref, w_ref, y2_ref, st_ref):
    _, H, W, P = y1_ref.shape
    M = H * W
    Pout = w_ref.shape[-1]

    # Fused BN (pre-folded scale/shift) + ReLU in f32, then one cast to bf16
    # before any shifted view is built.
    y = y1_ref[0].reshape(M, P)
    y = jnp.maximum(y * sc_ref[...] + sh_ref[...], 0.0)
    yb = y.reshape(H, W, P).astype(jnp.bfloat16)

    zcol = jnp.zeros((H, 1, P), jnp.bfloat16)
    zrow = jnp.zeros((1, W, P), jnp.bfloat16)
    # dx-shifted views: cols[kw][h, w] = y[h, w + (kw-1)], zero outside.
    cols = (
        jnp.concatenate([zcol, yb[:, :W - 1, :]], axis=1),   # dx = -1
        yb,                                                  # dx =  0
        jnp.concatenate([yb[:, 1:, :], zcol], axis=1),       # dx = +1
    )

    acc = jnp.zeros((M, Pout), jnp.float32)
    for kh in range(3):
        dy = kh - 1
        for kw in range(3):
            c = cols[kw]
            # dy shift = whole-row moves along the non-minor H axis (cheap,
            # no sublane relayout).
            if dy == -1:
                tap = jnp.concatenate([zrow, c[:H - 1]], axis=0)
            elif dy == 1:
                tap = jnp.concatenate([c[1:], zrow], axis=0)
            else:
                tap = c
            acc = acc + jnp.dot(tap.reshape(M, P), w_ref[kh * 3 + kw],
                                preferred_element_type=jnp.float32)

    y2_ref[0] = acc.reshape(H, W, Pout)
    s = jnp.sum(acc, axis=0, keepdims=True)
    ss = jnp.sum(acc * acc, axis=0, keepdims=True)
    st_ref[0] = jnp.concatenate([s, ss], axis=0)


# ---------------------------------------------------------------------------
# Pass 3: bn2 + relu + conv3 (1x1)  ->  raw + per-tile BN partial stats.
# ---------------------------------------------------------------------------
def bn_relu_conv1x1_stats_kernel(y2_ref, sc_ref, sh_ref, w_ref, y3_ref, st_ref):
    _, H, W, P = y2_ref.shape
    M = H * W
    y = y2_ref[0].reshape(M, P)
    y = jnp.maximum(y * sc_ref[...] + sh_ref[...], 0.0).astype(jnp.bfloat16)
    y3 = jnp.dot(y, w_ref[...], preferred_element_type=jnp.float32)
    y3_ref[0] = y3.reshape(H, W, y3.shape[-1])
    s = jnp.sum(y3, axis=0, keepdims=True)
    ss = jnp.sum(y3 * y3, axis=0, keepdims=True)
    st_ref[0] = jnp.concatenate([s, ss], axis=0)


# ---------------------------------------------------------------------------
# Pass 4: bn3 + identity residual add + relu.
# ---------------------------------------------------------------------------
def bn_add_relu_kernel(y3_ref, sc_ref, sh_ref, x_ref, o_ref):
    _, H, W, C = y3_ref.shape
    M = H * W
    y = y3_ref[0].reshape(M, C) * sc_ref[...] + sh_ref[...]
    out = jnp.maximum(y + x_ref[0].reshape(M, C), 0.0)
    o_ref[0] = out.reshape(H, W, C).astype(o_ref.dtype)


# ---------------------------------------------------------------------------
# Wrapper.
# ---------------------------------------------------------------------------
def _vmem_limit_bytes():
    # Re-derive per generation: ~96 MiB on 128-MiB parts (v5e/v6e), ~48 MiB on
    # the 64-MiB v7x.  Falls back to a safe 48 MiB.
    phys = 64 * 1024 * 1024
    try:
        phys = int(pltpu.get_tpu_info().vmem_capacity_bytes)
    except Exception:
        pass
    return min(phys * 3 // 4, 96 * 1024 * 1024)


def _bn_scale_shift(partials, gamma, beta, m):
    """Finalize training-mode BN from per-tile partial (sum, sumsq).  O(C)."""
    s = jnp.sum(partials[:, 0, :], axis=0)
    ss = jnp.sum(partials[:, 1, :], axis=0)
    mu = s / m
    var = ss / m - mu * mu
    scale = gamma.reshape(-1) * lax.rsqrt(var + EPS)
    shift = beta.reshape(-1) - mu * scale
    return scale.reshape(1, -1), shift.reshape(1, -1)


def bottleneck_forward(x_nhwc, params):
    """x_nhwc: (N, H, W, Cin) float32.  Returns (N, H, W, planes*4) float32."""
    N, H, W, Cin = x_nhwc.shape
    w1, w2, w3, g1, b1, g2, b2, g3, b3 = params
    P = w1.shape[1]
    Cout = w3.shape[1]
    assert Cin == Cout, "identity residual requires inplanes == planes*expansion"
    M = N * H * W

    # bf16 matmul operands; 3x3 kernel as (9, P, P) so each tap is one
    # MXU-accumulated matmul.
    w1b = w1.astype(jnp.bfloat16)
    w2b = w2.reshape(9, P, P).astype(jnp.bfloat16)
    w3b = w3.astype(jnp.bfloat16)

    cparams = pltpu.CompilerParams(
        dimension_semantics=("parallel",),       # batch tiles -> megacore
        vmem_limit_bytes=_vmem_limit_bytes())

    def tile_spec(c):
        return pl.BlockSpec((1, H, W, c), lambda n: (n, 0, 0, 0))

    def bcast_spec(shape):
        nd = len(shape)
        return pl.BlockSpec(shape, lambda n: (0,) * nd)

    def stat_spec(c):
        return pl.BlockSpec((1, 2, c), lambda n: (n, 0, 0))

    # ---- pass 1: conv1 + partial stats ------------------------------------
    y1_raw, st1 = pl.pallas_call(
        conv1x1_stats_kernel,
        grid=(N,),
        in_specs=[tile_spec(Cin), bcast_spec((Cin, P))],
        out_specs=(tile_spec(P), stat_spec(P)),
        out_shape=(jax.ShapeDtypeStruct((N, H, W, P), jnp.float32),
                   jax.ShapeDtypeStruct((N, 2, P), jnp.float32)),
        compiler_params=cparams,
        cost_estimate=pl.CostEstimate(
            flops=2 * M * Cin * P, transcendentals=0,
            bytes_accessed=4 * M * (Cin + 2 * P) + 2 * Cin * P),
    )(x_nhwc, w1b)
    sc1, sh1 = _bn_scale_shift(st1, g1, b1, M)

    # ---- pass 2: bn1 + relu + conv2 (3x3) + partial stats ------------------
    y2_raw, st2 = pl.pallas_call(
        bn_relu_conv3x3_stats_kernel,
        grid=(N,),
        in_specs=[tile_spec(P), bcast_spec((1, P)), bcast_spec((1, P)),
                  bcast_spec((9, P, P))],
        out_specs=(tile_spec(P), stat_spec(P)),
        out_shape=(jax.ShapeDtypeStruct((N, H, W, P), jnp.float32),
                   jax.ShapeDtypeStruct((N, 2, P), jnp.float32)),
        compiler_params=cparams,
        cost_estimate=pl.CostEstimate(
            flops=2 * M * 9 * P * P, transcendentals=0,
            bytes_accessed=4 * M * 3 * P + 2 * 9 * P * P),
    )(y1_raw, sc1, sh1, w2b)
    sc2, sh2 = _bn_scale_shift(st2, g2, b2, M)

    # ---- pass 3: bn2 + relu + conv3 (1x1) + partial stats ------------------
    y3_raw, st3 = pl.pallas_call(
        bn_relu_conv1x1_stats_kernel,
        grid=(N,),
        in_specs=[tile_spec(P), bcast_spec((1, P)), bcast_spec((1, P)),
                  bcast_spec((P, Cout))],
        out_specs=(tile_spec(Cout), stat_spec(Cout)),
        out_shape=(jax.ShapeDtypeStruct((N, H, W, Cout), jnp.float32),
                   jax.ShapeDtypeStruct((N, 2, Cout), jnp.float32)),
        compiler_params=cparams,
        cost_estimate=pl.CostEstimate(
            flops=2 * M * P * Cout, transcendentals=0,
            bytes_accessed=4 * M * (P + 2 * Cout) + 2 * P * Cout),
    )(y2_raw, sc2, sh2, w3b)
    sc3, sh3 = _bn_scale_shift(st3, g3, b3, M)

    # ---- pass 4: bn3 + residual + relu -------------------------------------
    out = pl.pallas_call(
        bn_add_relu_kernel,
        grid=(N,),
        in_specs=[tile_spec(Cout), bcast_spec((1, Cout)), bcast_spec((1, Cout)),
                  tile_spec(Cout)],
        out_specs=tile_spec(Cout),
        out_shape=jax.ShapeDtypeStruct((N, H, W, Cout), jnp.float32),
        compiler_params=cparams,
        cost_estimate=pl.CostEstimate(
            flops=4 * M * Cout, transcendentals=0,
            bytes_accessed=4 * M * 3 * Cout),
    )(y3_raw, sc3, sh3, x_nhwc)
    return out


# ------------------------- pure-JAX reference ------------------------------
# Uses the same bf16 matmul operands / f32 accumulation as the kernel so the
# comparison is apples-to-apples; BN / residual math stays in f32.
def reference_forward(x_nhwc, params):
    w1, w2, w3, g1, b1, g2, b2, g3, b3 = params
    Cin = x_nhwc.shape[-1]
    P = w1.shape[1]
    Cout = w3.shape[1]
    dn = ("NHWC", "HWIO", "NHWC")

    def conv(x, w, pad):
        return lax.conv_general_dilated(
            x.astype(jnp.bfloat16), w.astype(jnp.bfloat16), (1, 1), pad,
            dimension_numbers=dn, preferred_element_type=jnp.float32)

    def bn(y, g, b):
        mu = y.mean(axis=(0, 1, 2), keepdims=True)
        var = ((y - mu) ** 2).mean(axis=(0, 1, 2), keepdims=True)
        return (y - mu) * lax.rsqrt(var + EPS) * g.reshape(1, 1, 1, -1) \
               + b.reshape(1, 1, 1, -1)

    y = conv(x_nhwc, w1.reshape(1, 1, Cin, P), "VALID")
    y = jnp.maximum(bn(y, g1, b1), 0.0)
    y = conv(y, w2, "SAME")
    y = jnp.maximum(bn(y, g2, b2), 0.0)
    y = conv(y, w3.reshape(1, 1, P, Cout), "VALID")
    y = bn(y, g3, b3)
    return jnp.maximum(y + x_nhwc, 0.0)


if __name__ == "__main__":
    # Small shapes consistent with the module: inplanes = planes * expansion.
    N, H, W = 2, 16, 16
    planes = 4
    inplanes = planes * 4          # 16 -> identity residual is valid

    key = jax.random.PRNGKey(0)
    ks = jax.random.split(key, 10)

    # Parameter shapes (from nn.Module __init__), stored TPU-friendly:
    #   conv1: (planes, inplanes, 1, 1) -> (inplanes, planes)
    #   conv2: (planes, planes, 3, 3)   -> (3, 3, planes, planes)  (HWIO)
    #   conv3: (planes*4, planes, 1, 1) -> (planes, planes*4)
    w1 = jax.random.normal(ks[0], (inplanes, planes), jnp.float32) * 0.1
    w2 = jax.random.normal(ks[1], (3, 3, planes, planes), jnp.float32) * 0.1
    w3 = jax.random.normal(ks[2], (planes, planes * 4), jnp.float32) * 0.1
    g1 = 1.0 + 0.1 * jax.random.normal(ks[3], (1, planes), jnp.float32)
    b1 = 0.1 * jax.random.normal(ks[4], (1, planes), jnp.float32)
    g2 = 1.0 + 0.1 * jax.random.normal(ks[5], (1, planes), jnp.float32)
    b2 = 0.1 * jax.random.normal(ks[6], (1, planes), jnp.float32)
    g3 = 1.0 + 0.1 * jax.random.normal(ks[7], (1, planes * 4), jnp.float32)
    b3 = 0.1 * jax.random.normal(ks[8], (1, planes * 4), jnp.float32)
    params = (w1, w2, w3, g1, b1, g2, b2, g3, b3)

    # Input: PyTorch would be NCHW (2, 16, 16, 16); kernels work in NHWC.
    x_nchw = jax.random.normal(ks[9], (N, inplanes, H, W), jnp.float32)
    x_nhwc = jnp.transpose(x_nchw, (0, 2, 3, 1))

    out = jax.block_until_ready(bottleneck_forward(x_nhwc, params))
    ref = jax.block_until_ready(reference_forward(x_nhwc, params))

    assert out.shape == (N, H, W, planes * 4)
    max_diff = float(jnp.max(jnp.abs(out - ref)))
    assert jnp.allclose(out, ref, atol=5e-3, rtol=5e-3), \
        f"max abs diff {max_diff}"

    print("KERNEL_OK")
</pallas_src>

<mosaic_0001>
module attributes {stable_mosaic.version = 11 : i64} {
  func.func @conv1x1_stats_kernel(%arg0: i32, %arg1: memref<1x16x16x16xf32, #tpu.memory_space<vmem>>, %arg2: memref<16x4xbf16, #tpu.memory_space<vmem>>, %arg3: memref<1x16x16x4xf32, #tpu.memory_space<vmem>>, %arg4: memref<1x2x4xf32, #tpu.memory_space<vmem>>) attributes {dimension_semantics = [#tpu.dimension_semantics<parallel>], iteration_bounds = array<i64: 2>, scalar_prefetch = 0 : i64, scratch_operands = 0 : i64, tpu.core_type = #tpu.core_type<tc>, window_params = [{transform_indices = @transform_0, window_bounds = array<i64: 1, 16, 16, 16>}, {pipeline_mode = #tpu.pipeline_mode<synchronous>, transform_indices = @transform_1, window_bounds = array<i64: 16, 4>}, {transform_indices = @transform_2, window_bounds = array<i64: 1, 16, 16, 4>}, {transform_indices = @transform_3, window_bounds = array<i64: 1, 2, 4>}]} {
    %c0 = arith.constant 0 : index
    %c0_0 = arith.constant 0 : index
    %c0_1 = arith.constant 0 : index
    %c0_2 = arith.constant 0 : index
    %0 = vector.load %arg1[%c0, %c0_0, %c0_1, %c0_2] : memref<1x16x16x16xf32, #tpu.memory_space<vmem>>, vector<1x16x16x16xf32>
    %1 = vector.shape_cast %0 : vector<1x16x16x16xf32> to vector<16x16x16xf32>
    %2 = vector.shape_cast %1 : vector<16x16x16xf32> to vector<256x16xf32>
    %3 = arith.truncf %2 : vector<256x16xf32> to vector<256x16xbf16>
    %c0_3 = arith.constant 0 : index
    %c0_4 = arith.constant 0 : index
    %4 = vector.load %arg2[%c0_3, %c0_4] : memref<16x4xbf16, #tpu.memory_space<vmem>>, vector<16x4xbf16>
    %cst = arith.constant dense<0.000000e+00> : vector<256x4xf32>
    %5 = tpu.matmul %3, %4, %cst {dimension_numbers = #tpu.dot_dimension_numbers<[1], [0], [0], [1], [0, 0, 1, 1], [], []>} : vector<256x16xbf16>, vector<16x4xbf16>, vector<256x4xf32> -> vector<256x4xf32>
    %6 = vector.shape_cast %5 : vector<256x4xf32> to vector<16x16x4xf32>
    %c0_5 = arith.constant 0 : index
    %c0_6 = arith.constant 0 : index
    %c0_7 = arith.constant 0 : index
    %c0_8 = arith.constant 0 : index
    %7 = vector.load %arg3[%c0_5, %c0_6, %c0_7, %c0_8] : memref<1x16x16x4xf32, #tpu.memory_space<vmem>>, vector<1x16x16x4xf32>
    %8 = vector.shape_cast %7 : vector<1x16x16x4xf32> to vector<16x16x4xf32>
    %9 = vector.shape_cast %6 : vector<16x16x4xf32> to vector<1x16x16x4xf32>
    tpu.vector_store %arg3[%c0_5, %c0_6, %c0_7, %c0_8], %9 {strides = array<i32>} : memref<1x16x16x4xf32, #tpu.memory_space<vmem>>, vector<1x16x16x4xf32>,
    %cst_9 = arith.constant dense<0.000000e+00> : vector<4xf32>
    %10 = vector.multi_reduction <add>, %5, %cst_9 [0] : vector<256x4xf32> to vector<4xf32>
    %11 = vector.shape_cast %10 : vector<4xf32> to vector<1x4xf32>
    %12 = arith.mulf %5, %5 : vector<256x4xf32>
    %cst_10 = arith.constant dense<0.000000e+00> : vector<4xf32>
    %13 = vector.multi_reduction <add>, %12, %cst_10 [0] : vector<256x4xf32> to vector<4xf32>
    %14 = vector.shape_cast %13 : vector<4xf32> to vector<1x4xf32>
    %15 = tpu.concatenate %11, %14 in 0 : vector<1x4xf32>, vector<1x4xf32> -> vector<2x4xf32>
    %c0_11 = arith.constant 0 : index
    %c0_12 = arith.constant 0 : index
    %c0_13 = arith.constant 0 : index
    %16 = vector.load %arg4[%c0_11, %c0_12, %c0_13] : memref<1x2x4xf32, #tpu.memory_space<vmem>>, vector<1x2x4xf32>
    %17 = vector.shape_cast %16 : vector<1x2x4xf32> to vector<2x4xf32>
    %18 = vector.shape_cast %15 : vector<2x4xf32> to vector<1x2x4xf32>
    tpu.vector_store %arg4[%c0_11, %c0_12, %c0_13], %18 {strides = array<i32>} : memref<1x2x4xf32, #tpu.memory_space<vmem>>, vector<1x2x4xf32>,
    return
  }
  func.func @transform_0(%arg0: i32) -> (i32, i32, i32, i32) {
    %c0_i32 = arith.constant 0 : i32
    %c0_i32_0 = arith.constant 0 : i32
    %c0_i32_1 = arith.constant 0 : i32
    %c0_i32_2 = arith.constant 0 : i32
    return %arg0, %c0_i32, %c0_i32_0, %c0_i32_1 : i32, i32, i32, i32
  }
  func.func @transform_1(%arg0: i32) -> (i32, i32) {
    %c0_i32 = arith.constant 0 : i32
    %c0_i32_0 = arith.constant 0 : i32
    %c0_i32_1 = arith.constant 0 : i32
    return %c0_i32, %c0_i32_0 : i32, i32
  }
  func.func @transform_2(%arg0: i32) -> (i32, i32, i32, i32) {
    %c0_i32 = arith.constant 0 : i32
    %c0_i32_0 = arith.constant 0 : i32
    %c0_i32_1 = arith.constant 0 : i32
    %c0_i32_2 = arith.constant 0 : i32
    return %arg0, %c0_i32, %c0_i32_0, %c0_i32_1 : i32, i32, i32, i32
  }
  func.func @transform_3(%arg0: i32) -> (i32, i32, i32) {
    %c0_i32 = arith.constant 0 : i32
    %c0_i32_0 = arith.constant 0 : i32
    %c0_i32_1 = arith.constant 0 : i32
    return %arg0, %c0_i32, %c0_i32_0 : i32, i32, i32
  }
}

</mosaic_0001>

<bundles_post_ra>
// kernel: tpu_custom_call.1
= control target key start
LH: loop header
LB: loop body
LE: loop exit
PB: predicated region body
PF: predicated region fallthrough
CT: control target
= control target key end

     0   :  { %9 = vsyncpa [#allocation3], 0  ;;  %s1478_s0 = inlined_call_operand.hbm [shape: f32[2,16,16,16], index: 0, kind: input, shape index: {}]   ;;  %s1479_s1 = inlined_call_operand.vmem [shape: bf16[16,4], index: 1, kind: input, shape index: {}]   ;;  %s1480_s2 = inlined_call_operand.vmem [shape: f32[2,16,16,4], index: 2, kind: output, shape index: {0}]   ;;  %s1481_s3 = inlined_call_operand.hbm [shape: f32[2,2,4], index: 3, kind: output, shape index: {1}]  }
   0x1   :  { %11 = vsyncpa [#allocation3 + $0x1], 0 }
   0x2   :  { %12 = vsyncpa [#allocation4], 0 }
   0x3   :  { %14 = vsyncpa [#allocation4 + $0x1], 0  ;;  %s1047_s12 = smov 0   ;;  %s1049_s13 = smov 0  }
   0x4   :  { %s1051_s14 = smov 0   ;;  %s1053_s15 = smov 0  }
   0x5 LB: > { %s1068_s16 = sadd.s32 4294967295, %s1021_s15   ;;  %s793_s17 = sadd.s32 4294967294, %s1021_s15   ;;  %s1021_s15 = sphi %s1053_s15, %s1496_s15   ;;  %s1017_s14 = sphi %s1051_s14, %s1495_s14   ;;  %s1013_s13 = sphi %s1049_s13, %s1494_s13   ;;  %s1009_s12 = sphi %s1047_s12, %s1493_s12  }
   0x6   : > { %s1072_s18 = sadd.s32 1, %s1021_s15   ;;  %s27_s19 = sadd.s32 1, %s1017_s14 }
   0x7   : > { %s24_s20 = ssub.s32 %s1021_s15, %s1072_s18  ;;  %p34_p0 = scmp.ne.s32.totalorder %s1017_s14, %s1013_s13 }
   0x8   : > { %p25_p1 = scmp.eq.s32.totalorder %s24_s20, 0  ;;  %p35_p2 = scmp.eq.s32.totalorder %s1021_s15, 0 }
   0x9   : > { %p40_p3 = scmp.ne.s32.totalorder %s1013_s13, %s1009_s12  ;;  %p41_p4 = scmp.eq.s32.totalorder %s1068_s16, 0 }
   0xa   : > { %s1084_s21 = scalar_select %p25_p1, %s1017_s14, %s27_s19  }
   0xb   : > { %p1086_p5 = por %p35_p2, %p34_p0  ;;  %p1090_p6 = por %p41_p4, %p40_p3 }
   0xc   : > { %p111_p7 = scmp.eq.s32.totalorder %s1068_s16, 1  ;;  %p117_p8 = scmp.eq.s32.totalorder %s793_s17, 1 }
   0xd   : > { %s1485_s23 = scalar_select %p1090_p6, 1, 0 }
   0xe   : > { %p892_p10 = scmp.lt.s32.totalorder %s1021_s15, 2  ;;  %p1097_p11 = por %p111_p7, %p34_p0 }
   0xf   : > { %p1101_p12 = por %p117_p8, %p40_p3  ;;  %s140_s26 = sand.u32 1, %s1017_s14  }
  0x10   : > { %s1486_s24 = scalar_select %p1097_p11, 1, 0 }
  0x11   : > { %s1487_s25 = scalar_select %p1101_p12, 1, 0 }
  0x12   : > { %s825_s27 = sshll.u32 %s1021_s15, 12  ;;  %s796_s28 = sshll.u32 %s140_s26, 8 }
  0x13   : > { %s1110_s4 = scalar_lea.hbm %s1478_s0, %s825_s27  ;;  %s144_s5 = scalar_lea.vmem [#allocation2], %s796_s28 }
  0x14   : > { %s151_s6 = sshll.u32 %s144_s5, 4  ;;  %p1114_p13 = pnand %p892_p10, %p1086_p5  ;;  %s1118_s6 = int_to_ptr.vmem [resolvable:$true] %s151_s6 }
  0x15   : > { %s1120_s8 = scalar_lea.sflag [#allocation3], %s140_s26  ;;  %s929_s9 = scalar_lea.hbm %s1110_s4, 4096 }
  0x16   : > { %p930_p0 = scmp.ne.s32.totalorder %s1110_s4, %s929_s9  ;;  %p931_p1 = pneg %p1114_p13 }
  0x17   : > { %s934_s17 = scalar_lea.hbm %s1478_s0, 8192  ;;  %p935_p4 = scmp.lt.s32.totalorder %s1110_s4, %s1478_s0 }
  0x18   : > { %p932_p2 = pnand %p931_p1, %p930_p0  ;;  %p936_p5 = scmp.lt.s32.totalorder %s934_s17, %s929_s9 }
  0x1a   : > { %p933_p3 = pneg %p932_p2  ;;  %p937_p7 = por %p936_p5, %p935_p4 }
  0x1c   : > { %p938_p8 = pnand %p937_p7, %p933_p3 }
  0x1e   : > { %941 = shalt.err (!%p938_p8)
}
  0x1f   : > { %s942_s22 = scalar_lea.vmem %s1118_s6, 4096  ;;  %s1023_s26 = smov [#allocation2]  }
  0x20   : > { %p943_p10 = scmp.ne.s32.totalorder %s1118_s6, %s942_s22  ;;  %s947_s27 = sshll.u32 %s1023_s26, 4  ;;  %s948_s27 = int_to_ptr.vmem [resolvable:$false] %s947_s27 }
  0x21   : > { %s949_s28 = scalar_lea.vmem %s948_s27, 8192  ;;  %p950_p2 = scmp.lt.s32.totalorder %s1118_s6, %s948_s27 }
  0x22   : > { %p945_p9 = pnand %p943_p10, %p931_p1  ;;  %p951_p12 = scmp.lt.s32.totalorder %s949_s28, %s942_s22 }
  0x24   : > { %p946_p0 = pneg %p945_p9  ;;  %p952_p11 = por %p951_p12, %p950_p2 }
  0x26   : > { %p953_p6 = pnand %p952_p11, %p946_p0 }
  0x28   : > { %956 = shalt.err (!%p953_p6)
}
  0x29   : > { %s1024_s29 = smov 128   ;;  %s1025_s30 = smov 8  }
  0x2a   : > { %887 = dma.hbm_to_vmem [thread:$0]  (!%p1114_p13), %s1110_s4, 4096, %s1118_s6, %s1120_s8, %s1024_s29, %s1024_s29, %s1025_s30  }
  0x2b   : > { %p799_p9 = scmp.ge.s32.totalorder %s1021_s15, 1  ;;  %p159_p1 = scmp.lt.s32.totalorder %s1021_s15, 3 }
  0x2d   : > { %p160_p3 = pnand %p799_p9, %p159_p1 }
  0x2e   : > { %s1144_s5 = sand.u32 (!%p160_p3), 1, %s1013_s13   ;;  %p1489_p6 = scmp.ne.s32.totalorder (!%p160_p3), %s1485_s23, 0 }
  0x2f   : > { %163 = sbr.rel (%p160_p3) target bundleno = 348 (0x15c), region = 28  ;;  %s800_s9 = sshll.u32 (!%p160_p3), %s1144_s5, 8 }
  0x30   : > { %s166_s10 = scalar_lea.sflag (!%p160_p3), [#allocation3], %s1144_s5  ;;  %s1148_s11 = scalar_lea.vmem (!%p160_p3), [#allocation2], %s800_s9 }
  0x34   : > { %1000 = dma.done.wait (%p1489_p6), %s166_s10, 4096  }
  0x35   : > { %1002 = vsyncadd (%p1489_p6), %s166_s10, 4294963200  ;;  %v928_v0 = vld [vmem:[%s1479_s1] sm:$0xff]   ;;  %v204_v2 = vld [vmem:[%s1148_s11 + $0x8] sm:$0xff]  ;;  %vm259_vm0 = vcmask 130048   ;;  %p197_p11 = scmp.lt.s32.totalorder %s1068_s16, 1  ;;  %vm469_vm1 = vcmask 31744  }
  0x36   : > { %v203_v1 = vld [vmem:[%s1148_s11] sm:$0xff]  ;;  %v205_v3 = vld [vmem:[%s1148_s11 + $0x10] sm:$0xff]  ;;  %844 = vmatprep.subr.bf16.mxu0 %v928_v0  ;;  %v206_v5 = vld [vmem:[%s1148_s11 + $0x18] sm:$0xff]  ;;  %878 = vmatprep.subr.bf16.mxu1 %v928_v0  ;;  %s801_s20 = sshll.u32 %s1144_s5, 1  ;;  %s822_s22 = sshll.u32 %s1068_s16, 5  ;;  %vm672_vm2 = vcmask 1040384  }
  0x37   : > { %v235_v4 = vpack.c.bf16 %v204_v2, %v203_v1  ;;  %v207_v6 = vld [vmem:[%s1148_s11 + $0x20] sm:$0xff]  ;;  %v208_v7 = vld [vmem:[%s1148_s11 + $0x28] sm:$0xff]  ;;  %845 = vmatpush3.bf16.msra.mxu0 %v928_v0  ;;  %v236_v8 = vpack.c.bf16 %v206_v5, %v205_v3  ;;  %879 = vmatpush3.bf16.msra.mxu1 %v928_v0  ;;  %v209_v10 = vld [vmem:[%s1148_s11 + $0x30] sm:$0xff]  ;;  %s198_s23 = scalar_select %p197_p11, %s1068_s16, 1  ;;  %vm674_vm3 = vcmask 25600  }
  0x38   : > { %v237_v9 = vpack.c.bf16 %v208_v7, %v207_v6  ;;  %v210_v11 = vld [vmem:[%s1148_s11 + $0x38] sm:$0xff]  ;;  %v219_v12 = vld [vmem:[%s1148_s11 + $0x80] sm:$0xff]  ;;  %v220_v13 = vld [vmem:[%s1148_s11 + $0x88] sm:$0xff]  ;;  %s196_s26 = scalar_lea.vmem [#allocation5], %s801_s20  ;;  %s1441_s30 = scalar_lea.hbm %s1481_s3, %s822_s22 }
  0x39   : > { %846 = vmatprep.mubr.msk.bf16.mxu0 %vm259_vm0, %v235_v4  ;;  %v243_v14 = vpack.c.bf16 %v220_v13, %v219_v12  ;;  %v221_v15 = vld [vmem:[%s1148_s11 + $0x90] sm:$0xff]  ;;  %v222_v16 = vld [vmem:[%s1148_s11 + $0x98] sm:$0xff]  ;;  %v223_v17 = vld [vmem:[%s1148_s11 + $0xa0] sm:$0xff]  ;;  %v238_v23 = vpack.c.bf16 %v210_v11, %v209_v10  ;;  %s826_s7 = sshll.u32 %s198_s23, 8  ;;  %s698_s27 = sshll.u32 %s196_s26, 4  ;;  %s699_s27 = int_to_ptr.vmem [resolvable:$true] %s698_s27 }
  0x3a   : > { %847 = vmatmul.mubr.msk.bf16.vlgmr.msra.gmra.mxu0 %vm259_vm0, %v236_v8  ;;  %v211_v18 = vld [vmem:[%s1148_s11 + $0x40] sm:$0xff]  ;;  %v212_v19 = vld [vmem:[%s1148_s11 + $0x48] sm:$0xff]  ;;  %v244_v20 = vpack.c.bf16 %v222_v16, %v221_v15  ;;  %v225_v25 = vld [vmem:[%s1148_s11 + $0xb0] sm:$0xff]  ;;  %s1210_s19 = scalar_lea.vmem %s1480_s2, %s826_s7  ;;  %s682_s9 = scalar_lea.sflag [#allocation4], %s1144_s5 }
  0x3b   : > { %850 = vmatprep.mubr.msk.bf16.mxu0 %vm259_vm0, %v237_v9  ;;  %v224_v21 = vld [vmem:[%s1148_s11 + $0xa8] sm:$0xff]  ;;  %862 = vmatprep.mubr.msk.bf16.mxu1 %vm259_vm0, %v243_v14  ;;  %v239_v24 = vpack.c.bf16 %v212_v19, %v211_v18  ;;  %v226_v26 = vld [vmem:[%s1148_s11 + $0xb8] sm:$0xff]  ;;  %v227_v27 = vld [vmem:[%s1148_s11 + $0xc0] sm:$0xff]  ;;  %s957_s10 = scalar_lea.vmem %s699_s27, 32  ;;  %p1490_p13 = scmp.ne.s32.totalorder %s1486_s24, 0 }
  0x3c   : > { %v245_v22 = vpack.c.bf16 %v224_v21, %v223_v17  ;;  %863 = vmatmul.mubr.msk.bf16.vlgmr.msra.gmra.mxu1 %vm259_vm0, %v244_v20  ;;  %v228_v28 = vld [vmem:[%s1148_s11 + $0xc8] sm:$0xff]  ;;  %v246_v29 = vpack.c.bf16 %v226_v26, %v225_v25  ;;  %v213_v30 = vld [vmem:[%s1148_s11 + $0x50] sm:$0xff]  ;;  %v214_v31 = vld [vmem:[%s1148_s11 + $0x58] sm:$0xff]  ;;  %p958_p12 = scmp.ne.s32.totalorder %s699_s27, %s957_s10  ;;  %s1026_s16 = smov [#allocation5]  }
  0x3d   : > { %v247_v32 = vpack.c.bf16 %v228_v28, %v227_v27  ;;  %v215_v33 = vld [vmem:[%s1148_s11 + $0x60] sm:$0xff]  ;;  %v216_v34 = vld [vmem:[%s1148_s11 + $0x68] sm:$0xff]  ;;  %v240_v35 = vpack.c.bf16 %v214_v31, %v213_v30  ;;  %v229_v37 = vld [vmem:[%s1148_s11 + $0xd0] sm:$0xff] }
  0x3e   : > { %866 = vmatprep.mubr.msk.bf16.mxu1 %vm259_vm0, %v245_v22  ;;  %v241_v36 = vpack.c.bf16 %v216_v34, %v215_v33  ;;  %v230_v38 = vld [vmem:[%s1148_s11 + $0xd8] sm:$0xff]  ;;  %v231_v39 = vld [vmem:[%s1148_s11 + $0xe0] sm:$0xff]  ;;  %v232_v40 = vld [vmem:[%s1148_s11 + $0xe8] sm:$0xff]  ;;  %p959_p4 = pnand %p958_p12, %p1490_p13 }
  0x3f   : > { %v248_v41 = vpack.c.bf16 %v230_v38, %v229_v37  ;;  %v217_v42 = vld [vmem:[%s1148_s11 + $0x70] sm:$0xff]  ;;  %v218_v43 = vld [vmem:[%s1148_s11 + $0x78] sm:$0xff]  ;;  %v249_v44 = vpack.c.bf16 %v232_v40, %v231_v39 }
  0x40   : > { %v242_v45 = vpack.c.bf16 %v218_v43, %v217_v42  ;;  %v233_v46 = vld [vmem:[%s1148_s11 + $0xf0] sm:$0xff]  ;;  %v234_v47 = vld [vmem:[%s1148_s11 + $0xf8] sm:$0xff]  ;;  %p960_p5 = pneg %p959_p4  ;;  %s961_s11 = sshll.u32 %s1026_s16, 4  ;;  %s962_s11 = int_to_ptr.vmem [resolvable:$false] %s961_s11 }
  0x41   : > { %v250_v48 = vpack.c.bf16 %v234_v47, %v233_v46  ;;  %s963_s4 = scalar_lea.vmem %s962_s11, 64  ;;  %p964_p7 = scmp.lt.s32.totalorder %s699_s27, %s962_s11 }
  0x42   : > { %851 = vmatmul.mubr.msk.bf16.gmra.mxu0 %vm259_vm0, %v238_v23  ;;  %p965_p8 = scmp.lt.s32.totalorder %s963_s4, %s957_s10 }
  0x43   : > { %854 = vmatprep.mubr.msk.bf16.mxu0 %vm259_vm0, %v239_v24 }
  0x44   : > { %867 = vmatmul.mubr.msk.bf16.gmra.mxu1 %vm259_vm0, %v246_v29  ;;  %p966_p10 = por %p965_p8, %p964_p7 }
  0x45   : > { %870 = vmatprep.mubr.msk.bf16.mxu1 %vm259_vm0, %v247_v32 }
  0x46   : > { %p967_p0 = pnand %p966_p10, %p960_p5 }
  0x4a   : > { %855 = vmatmul.mubr.msk.bf16.gmra.mxu0 %vm259_vm0, %v240_v35 }
  0x4b   : > { %858 = vmatprep.mubr.msk.bf16.mxu0 %vm259_vm0, %v241_v36 }
  0x4c   : > { %871 = vmatmul.mubr.msk.bf16.gmra.mxu1 %vm259_vm0, %v248_v41 }
  0x4d   : > { %874 = vmatprep.mubr.msk.bf16.mxu1 %vm259_vm0, %v249_v44 }
  0x52   : > { %859 = vmatmul.mubr.msk.bf16.gmra.mxu0 %vm259_vm0, %v242_v45 }
  0x54   : > { %875 = vmatmul.mubr.msk.bf16.gmra.mxu1 %vm259_vm0, %v250_v48 }
  0xfa   : > { %v848_v49 = vpop.f32.mrf.mxu0 }
  0xfb   : > { %472 = vst.msk [vmem:[%s1210_s19 + $0x10] sm:$0xff] %vm469_vm1, %v848_v49  ;;  %v573_v56 = vmul.f32 %v848_v49, %v848_v49  ;;  %v505_v63 = vsel %vm469_vm1, %v848_v49, 0.0 }
  0xfc   : > { %v342_v50 = vpop.f32.mrf.mxu0  ;;  %v1216_v52 = vpop.f32.mrf.mxu1 }
  0xfd   : > { %470 = vst.msk [vmem:[%s1210_s19] sm:$0xff] %vm469_vm1, %v342_v50  ;;  %v571_v53 = vmul.f32 %v342_v50, %v342_v50  ;;  %488 = vst.msk [vmem:[%s1210_s19 + $0x90] sm:$0xff] %vm469_vm1, %v1216_v52  ;;  %v502_v57 = vsel %vm469_vm1, %v342_v50, 0.0  ;;  %v606_v7 = vsel %vm469_vm1, %v573_v56, 0.0 }
  0xfe   : > { %v849_v51 = vpop.f32.mrf.mxu0  ;;  %v1223_v55 = vpop.f32.mrf.mxu1 }
  0xff   : > { %473 = vst.msk [vmem:[%s1210_s19 + $0x18] sm:$0xff] %vm469_vm1, %v849_v51  ;;  %486 = vst.msk [vmem:[%s1210_s19 + $0x80] sm:$0xff] %vm469_vm1, %v1223_v55  ;;  %v603_v0 = vsel %vm469_vm1, %v571_v53, 0.0  ;;  %v574_v1 = vmul.f32 %v849_v51, %v849_v51  ;;  %v507_v8 = vsel %vm469_vm1, %v849_v51, 0.0 }
 0x100   : > { %v345_v54 = vpop.f32.mrf.mxu0  ;;  %v1232_v62 = vpop.f32.mrf.mxu1 }
 0x101   : > { %471 = vst.msk [vmem:[%s1210_s19 + $0x8] sm:$0xff] %vm469_vm1, %v345_v54  ;;  %v503_v58 = vsel %vm469_vm1, %v345_v54, 0.0  ;;  %v572_v59 = vmul.f32 %v345_v54, %v345_v54  ;;  %489 = vst.msk [vmem:[%s1210_s19 + $0x98] sm:$0xff] %vm469_vm1, %v1232_v62  ;;  %v608_v14 = vsel %vm469_vm1, %v574_v1, 0.0 }
 0x102   : > { %v504_v60 = vadd.f32 %v503_v58, %v502_v57  ;;  %v852_v61 = vpop.f32.mrf.mxu0  ;;  %v1242_v6 = vpop.f32.mrf.mxu1 }
 0x103   : > { %v604_v2 = vsel %vm469_vm1, %v572_v59, 0.0  ;;  %476 = vst.msk [vmem:[%s1210_s19 + $0x30] sm:$0xff] %vm469_vm1, %v852_v61  ;;  %487 = vst.msk [vmem:[%s1210_s19 + $0x88] sm:$0xff] %vm469_vm1, %v1242_v6  ;;  %v577_v20 = vmul.f32 %v852_v61, %v852_v61  ;;  %v513_v28 = vsel %vm469_vm1, %v852_v61, 0.0 }
 0x104   : > { %v506_v3 = vadd.f32 %v505_v63, %v504_v60  ;;  %v605_v4 = vadd.f32 %v604_v2, %v603_v0  ;;  %v358_v5 = vpop.f32.mrf.mxu0  ;;  %v1251_v13 = vpop.f32.mrf.mxu1 }
 0x105   : > { %474 = vst.msk [vmem:[%s1210_s19 + $0x20] sm:$0xff] %vm469_vm1, %v358_v5  ;;  %v575_v9 = vmul.f32 %v358_v5, %v358_v5  ;;  %v509_v15 = vsel %vm469_vm1, %v358_v5, 0.0  ;;  %492 = vst.msk [vmem:[%s1210_s19 + $0xb0] sm:$0xff] %vm469_vm1, %v1251_v13  ;;  %v614_v35 = vsel %vm469_vm1, %v577_v20, 0.0 }
 0x106   : > { %v607_v10 = vadd.f32 %v606_v7, %v605_v4  ;;  %v508_v11 = vadd.f32 %v507_v8, %v506_v3  ;;  %v853_v12 = vpop.f32.mrf.mxu0  ;;  %v1260_v19 = vpop.f32.mrf.mxu1 }
 0x107   : > { %477 = vst.msk [vmem:[%s1210_s19 + $0x38] sm:$0xff] %vm469_vm1, %v853_v12  ;;  %v610_v21 = vsel %vm469_vm1, %v575_v9, 0.0  ;;  %490 = vst.msk [vmem:[%s1210_s19 + $0xa0] sm:$0xff] %vm469_vm1, %v1260_v19  ;;  %v578_v29 = vmul.f32 %v853_v12, %v853_v12  ;;  %v515_v36 = vsel %vm469_vm1, %v853_v12, 0.0 }
 0x108   : > { %v510_v16 = vadd.f32 %v509_v15, %v508_v11  ;;  %v609_v17 = vadd.f32 %v608_v14, %v607_v10  ;;  %v361_v18 = vpop.f32.mrf.mxu0  ;;  %v1269_v27 = vpop.f32.mrf.mxu1 }
 0x109   : > { %475 = vst.msk [vmem:[%s1210_s19 + $0x28] sm:$0xff] %vm469_vm1, %v361_v18  ;;  %v511_v22 = vsel %vm469_vm1, %v361_v18, 0.0  ;;  %v576_v23 = vmul.f32 %v361_v18, %v361_v18  ;;  %493 = vst.msk [vmem:[%s1210_s19 + $0xb8] sm:$0xff] %vm469_vm1, %v1269_v27  ;;  %v616_v42 = vsel %vm469_vm1, %v578_v29, 0.0 }
 0x10a   : > { %v611_v24 = vadd.f32 %v610_v21, %v609_v17  ;;  %v512_v25 = vadd.f32 %v511_v22, %v510_v16  ;;  %v856_v26 = vpop.f32.mrf.mxu0  ;;  %v1278_v34 = vpop.f32.mrf.mxu1 }
 0x10b   : > { %v612_v30 = vsel %vm469_vm1, %v576_v23, 0.0  ;;  %480 = vst.msk [vmem:[%s1210_s19 + $0x50] sm:$0xff] %vm469_vm1, %v856_v26  ;;  %491 = vst.msk [vmem:[%s1210_s19 + $0xa8] sm:$0xff] %vm469_vm1, %v1278_v34  ;;  %v581_v48 = vmul.f32 %v856_v26, %v856_v26  ;;  %v521_v58 = vsel %vm469_vm1, %v856_v26, 0.0 }
 0x10c   : > { %v514_v31 = vadd.f32 %v513_v28, %v512_v25  ;;  %v613_v32 = vadd.f32 %v612_v30, %v611_v24  ;;  %v374_v33 = vpop.f32.mrf.mxu0  ;;  %v1287_v41 = vpop.f32.mrf.mxu1 }
 0x10d   : > { %478 = vst.msk [vmem:[%s1210_s19 + $0x40] sm:$0xff] %vm469_vm1, %v374_v33  ;;  %v579_v37 = vmul.f32 %v374_v33, %v374_v33  ;;  %v517_v43 = vsel %vm469_vm1, %v374_v33, 0.0  ;;  %496 = vst.msk [vmem:[%s1210_s19 + $0xd0] sm:$0xff] %vm469_vm1, %v1287_v41  ;;  %v622_v2 = vsel %vm469_vm1, %v581_v48, 0.0 }
 0x10e   : > { %v615_v38 = vadd.f32 %v614_v35, %v613_v32  ;;  %v516_v39 = vadd.f32 %v515_v36, %v514_v31  ;;  %v857_v40 = vpop.f32.mrf.mxu0  ;;  %v1296_v47 = vpop.f32.mrf.mxu1  ;;  %v587_v35 = vmul.f32 %v1223_v55, %v1223_v55 }
 0x10f   : > { %481 = vst.msk [vmem:[%s1210_s19 + $0x58] sm:$0xff] %vm469_vm1, %v857_v40  ;;  %v618_v49 = vsel %vm469_vm1, %v579_v37, 0.0  ;;  %494 = vst.msk [vmem:[%s1210_s19 + $0xc0] sm:$0xff] %vm469_vm1, %v1296_v47  ;;  %v582_v59 = vmul.f32 %v857_v40, %v857_v40  ;;  %v523_v3 = vsel %vm469_vm1, %v857_v40, 0.0  ;;  %v588_v40 = vmul.f32 %v1242_v6, %v1242_v6 }
 0x110   : > { %v518_v44 = vadd.f32 %v517_v43, %v516_v39  ;;  %v617_v45 = vadd.f32 %v616_v42, %v615_v38  ;;  %v377_v46 = vpop.f32.mrf.mxu0  ;;  %v1305_v57 = vpop.f32.mrf.mxu1  ;;  %v533_v39 = vsel %vm469_vm1, %v1223_v55, 0.0  ;;  %v590_v55 = vmul.f32 %v1232_v62, %v1232_v62 }
 0x111   : > { %479 = vst.msk [vmem:[%s1210_s19 + $0x48] sm:$0xff] %vm469_vm1, %v377_v46  ;;  %v519_v50 = vsel %vm469_vm1, %v377_v46, 0.0  ;;  %v580_v51 = vmul.f32 %v377_v46, %v377_v46  ;;  %497 = vst.msk [vmem:[%s1210_s19 + $0xd8] sm:$0xff] %vm469_vm1, %v1305_v57  ;;  %v624_v10 = vsel %vm469_vm1, %v582_v59, 0.0  ;;  %v535_v46 = vsel %vm469_vm1, %v1242_v6, 0.0 }
 0x112   : > { %v619_v53 = vadd.f32 %v618_v49, %v617_v45  ;;  %v520_v54 = vadd.f32 %v519_v50, %v518_v44  ;;  %v860_v56 = vpop.f32.mrf.mxu0  ;;  %v1314_v1 = vpop.f32.mrf.mxu1  ;;  %v589_v44 = vmul.f32 %v1216_v52, %v1216_v52  ;;  %v634_v45 = vsel %vm469_vm1, %v587_v35, 0.0 }
 0x113   : > { %v620_v60 = vsel %vm469_vm1, %v580_v51, 0.0  ;;  %484 = vst.msk [vmem:[%s1210_s19 + $0x70] sm:$0xff] %vm469_vm1, %v860_v56  ;;  %495 = vst.msk [vmem:[%s1210_s19 + $0xc8] sm:$0xff] %vm469_vm1, %v1314_v1  ;;  %v585_v17 = vmul.f32 %v860_v56, %v860_v56  ;;  %v529_v25 = vsel %vm469_vm1, %v860_v56, 0.0  ;;  %v537_v50 = vsel %vm469_vm1, %v1216_v52, 0.0 }
 0x114   : > { %v522_v61 = vadd.f32 %v521_v58, %v520_v54  ;;  %v621_v63 = vadd.f32 %v620_v60, %v619_v53  ;;  %v390_v0 = vpop.f32.mrf.mxu0  ;;  %v1323_v9 = vpop.f32.mrf.mxu1  ;;  %v636_v51 = vsel %vm469_vm1, %v588_v40, 0.0  ;;  %v638_v56 = vsel %vm469_vm1, %v589_v44, 0.0 }
 0x115   : > { %482 = vst.msk [vmem:[%s1210_s19 + $0x60] sm:$0xff] %vm469_vm1, %v390_v0  ;;  %v583_v4 = vmul.f32 %v390_v0, %v390_v0  ;;  %v525_v11 = vsel %vm469_vm1, %v390_v0, 0.0  ;;  %500 = vst.msk [vmem:[%s1210_s19 + $0xf0] sm:$0xff] %vm469_vm1, %v1323_v9  ;;  %v630_v32 = vsel %vm469_vm1, %v585_v17, 0.0  ;;  %v539_v58 = vsel %vm469_vm1, %v1232_v62, 0.0 }
 0x116   : > { %v623_v5 = vadd.f32 %v622_v2, %v621_v63  ;;  %v524_v7 = vadd.f32 %v523_v3, %v522_v61  ;;  %v861_v8 = vpop.f32.mrf.mxu0  ;;  %v1332_v16 = vpop.f32.mrf.mxu1  ;;  %v591_v6 = vmul.f32 %v1260_v19, %v1260_v19  ;;  %v640_v61 = vsel %vm469_vm1, %v590_v55, 0.0 }
 0x117   : > { %485 = vst.msk [vmem:[%s1210_s19 + $0x78] sm:$0xff] %vm469_vm1, %v861_v8  ;;  %v626_v18 = vsel %vm469_vm1, %v583_v4, 0.0  ;;  %498 = vst.msk [vmem:[%s1210_s19 + $0xe0] sm:$0xff] %vm469_vm1, %v1332_v16  ;;  %v586_v26 = vmul.f32 %v861_v8, %v861_v8  ;;  %v531_v33 = vsel %vm469_vm1, %v861_v8, 0.0  ;;  %v541_v52 = vsel %vm469_vm1, %v1260_v19, 0.0 }
 0x118   : > { %v526_v12 = vadd.f32 %v525_v11, %v524_v7  ;;  %v625_v14 = vadd.f32 %v624_v10, %v623_v5  ;;  %v393_v15 = vpop.f32.mrf.mxu0  ;;  %v1341_v24 = vpop.f32.mrf.mxu1  ;;  %v592_v63 = vmul.f32 %v1278_v34, %v1278_v34  ;;  %v593_v3 = vmul.f32 %v1251_v13, %v1251_v13 }
 0x119   : > { %483 = vst.msk [vmem:[%s1210_s19 + $0x68] sm:$0xff] %vm469_vm1, %v393_v15  ;;  %v527_v20 = vsel %vm469_vm1, %v393_v15, 0.0  ;;  %v584_v21 = vmul.f32 %v393_v15, %v393_v15  ;;  %501 = vst.msk [vmem:[%s1210_s19 + $0xf8] sm:$0xff] %vm469_vm1, %v1341_v24  ;;  %v632_v38 = vsel %vm469_vm1, %v586_v26, 0.0  ;;  %v642_v62 = vsel %vm469_vm1, %v591_v6, 0.0 }
 0x11a   : > { %v627_v22 = vadd.f32 %v626_v18, %v625_v14  ;;  %v528_v23 = vadd.f32 %v527_v20, %v526_v12  ;;  %v1348_v31 = vpop.f32.mrf.mxu1  ;;  %v543_v4 = vsel %vm469_vm1, %v1278_v34, 0.0  ;;  %v545_v8 = vsel %vm469_vm1, %v1251_v13, 0.0 }
 0x11b   : > { %v628_v28 = vsel %vm469_vm1, %v584_v21, 0.0  ;;  %499 = vst.msk [vmem:[%s1210_s19 + $0xe8] sm:$0xff] %vm469_vm1, %v1348_v31  ;;  %v594_v19 = vmul.f32 %v1269_v27, %v1269_v27  ;;  %v644_v10 = vsel %vm469_vm1, %v592_v63, 0.0  ;;  %v646_v14 = vsel %vm469_vm1, %v593_v3, 0.0 }
 0x11c   : > { %v530_v29 = vadd.f32 %v529_v25, %v528_v23  ;;  %v629_v30 = vadd.f32 %v628_v28, %v627_v22  ;;  %v547_v15 = vsel %vm469_vm1, %v1269_v27, 0.0  ;;  %v595_v34 = vmul.f32 %v1296_v47, %v1296_v47 }
 0x11d   : > { %v648_v20 = vsel %vm469_vm1, %v594_v19, 0.0  ;;  %v549_v13 = vsel %vm469_vm1, %v1296_v47, 0.0  ;;  %v596_v21 = vmul.f32 %v1314_v1, %v1314_v1  ;;  %v597_v25 = vmul.f32 %v1287_v41, %v1287_v41 }
 0x11e   : > { %v532_v36 = vadd.f32 %v531_v33, %v530_v29  ;;  %v631_v37 = vadd.f32 %v630_v32, %v629_v30  ;;  %v650_v27 = vsel %vm469_vm1, %v595_v34, 0.0  ;;  %v551_v26 = vsel %vm469_vm1, %v1314_v1, 0.0 }
 0x11f   : > { %v553_v30 = vsel %vm469_vm1, %v1287_v41, 0.0  ;;  %v598_v47 = vmul.f32 %v1305_v57, %v1305_v57  ;;  %v652_v32 = vsel %vm469_vm1, %v596_v21, 0.0  ;;  %v599_v1 = vmul.f32 %v1332_v16, %v1332_v16 }
 0x120   : > { %v633_v42 = vadd.f32 %v632_v38, %v631_v37  ;;  %v534_v43 = vadd.f32 %v533_v39, %v532_v36  ;;  %v654_v36 = vsel %vm469_vm1, %v597_v25, 0.0  ;;  %v555_v37 = vsel %vm469_vm1, %v1305_v57, 0.0 }
 0x121   : > { %v656_v40 = vsel %vm469_vm1, %v598_v47, 0.0  ;;  %v557_v41 = vsel %vm469_vm1, %v1332_v16, 0.0  ;;  %v658_v57 = vsel %vm469_vm1, %v599_v1, 0.0  ;;  %v602_v16 = vmul.f32 %v1341_v24, %v1341_v24 }
 0x122   : > { %v536_v48 = vadd.f32 %v535_v46, %v534_v43  ;;  %v635_v49 = vadd.f32 %v634_v45, %v633_v42  ;;  %v600_v42 = vmul.f32 %v1348_v31, %v1348_v31  ;;  %v601_v45 = vmul.f32 %v1323_v9, %v1323_v9 }
 0x123   : > { %v559_v46 = vsel %vm469_vm1, %v1348_v31, 0.0  ;;  %v664_v6 = vsel %vm469_vm1, %v602_v16, 0.0 }
 0x124   : > { %v538_v53 = vadd.f32 %v537_v50, %v536_v48  ;;  %v637_v54 = vadd.f32 %v636_v51, %v635_v49  ;;  %v561_v50 = vsel %vm469_vm1, %v1323_v9, 0.0  ;;  %v660_v55 = vsel %vm469_vm1, %v600_v42, 0.0 }
 0x126   : > { %v639_v59 = vadd.f32 %v638_v56, %v637_v54  ;;  %v540_v60 = vadd.f32 %v539_v58, %v538_v53  ;;  %v662_v54 = vsel %vm469_vm1, %v601_v45, 0.0  ;;  %v563_v56 = vsel %vm469_vm1, %v1341_v24, 0.0 }
 0x128   : > { %v542_v0 = vadd.f32 %v541_v52, %v540_v60  ;;  %v641_v2 = vadd.f32 %v640_v61, %v639_v59 }
 0x12a   : > { %v643_v5 = vadd.f32 %v642_v62, %v641_v2  ;;  %v544_v7 = vadd.f32 %v543_v4, %v542_v0 }
 0x12c   : > { %v546_v11 = vadd.f32 %v545_v8, %v544_v7  ;;  %v645_v12 = vadd.f32 %v644_v10, %v643_v5 }
 0x12e   : > { %v647_v17 = vadd.f32 %v646_v14, %v645_v12  ;;  %v548_v18 = vadd.f32 %v547_v15, %v546_v11 }
 0x130   : > { %v550_v22 = vadd.f32 %v549_v13, %v548_v18  ;;  %v649_v23 = vadd.f32 %v648_v20, %v647_v17 }
 0x132   : > { %v651_v28 = vadd.f32 %v650_v27, %v649_v23  ;;  %v552_v29 = vadd.f32 %v551_v26, %v550_v22 }
 0x134   : > { %v554_v33 = vadd.f32 %v553_v30, %v552_v29  ;;  %v653_v35 = vadd.f32 %v652_v32, %v651_v28 }
 0x136   : > { %v655_v38 = vadd.f32 %v654_v36, %v653_v35  ;;  %v556_v39 = vadd.f32 %v555_v37, %v554_v33 }
 0x138   : > { %v558_v43 = vadd.f32 %v557_v41, %v556_v39  ;;  %v657_v44 = vadd.f32 %v656_v40, %v655_v38 }
 0x13a   : > { %v659_v48 = vadd.f32 %v658_v57, %v657_v44  ;;  %v560_v49 = vadd.f32 %v559_v46, %v558_v43 }
 0x13c   : > { %v562_v51 = vadd.f32 %v561_v50, %v560_v49  ;;  %v661_v53 = vadd.f32 %v660_v55, %v659_v48 }
 0x13e   : > { %v564_v31 = vadd.f32 %v563_v56, %v562_v51  ;;  %v663_v58 = vadd.f32 %v662_v54, %v661_v53 }
 0x140   : > { %v565_v59 = vrot.slane %v564_v31, 4  ;;  %v665_v9 = vadd.f32 %v664_v6, %v663_v58 }
 0x142   : > { %v566_v60 = vadd.f32 %v565_v59, %v564_v31  ;;  %v666_v61 = vrot.slane %v665_v9, 4 }
 0x144   : > { %v567_v52 = vrot.slane %v566_v60, 2  ;;  %v667_v63 = vadd.f32 %v666_v61, %v665_v9 }
 0x146   : > { %v568_v0 = vadd.f32 %v567_v52, %v566_v60  ;;  %v668_v2 = vrot.slane %v667_v63, 2 }
 0x148   : > { %v569_v3 = vrot.slane %v568_v0, 1  ;;  %v669_v62 = vadd.f32 %v668_v2, %v667_v63 }
 0x14a   : > { %v670_v4 = vrot.slane %v669_v62, 1  ;;  %v570_v24 = vadd.f32 %v569_v3, %v568_v0 }
 0x14c   : > { %v671_v5 = vadd.f32 %v670_v4, %v669_v62 }
 0x14e   : > { %v673_v7 = vsel %vm672_vm2, %v570_v24, %v671_v5 }
 0x14f   : > { %675 = vst.msk [vmem:[%s196_s26] sm:$0x3] %vm674_vm3, %v673_v7 }
 0x150   : > { %970 = shalt.err (!%p967_p0)
}
 0x151   : > { %s971_s6 = scalar_lea.hbm %s1441_s30, 32  ;;  %s975_s7 = scalar_lea.hbm %s1481_s3, 64 }
 0x152   : > { %p972_p2 = scmp.ne.s32.totalorder %s1441_s30, %s971_s6  ;;  %p976_p3 = scmp.lt.s32.totalorder %s1441_s30, %s1481_s3 }
 0x153   : > { %p977_p6 = scmp.lt.s32.totalorder %s975_s7, %s971_s6 }
 0x154   : > { %p973_p9 = pnand %p972_p2, %p1490_p13 }
 0x155   : > { %p978_p11 = por %p977_p6, %p976_p3 }
 0x156   : > { %p974_p1 = pneg %p973_p9 }
 0x158   : > { %p979_p12 = pnand %p978_p11, %p974_p1 }
 0x15a   : > { %982 = shalt.err (!%p979_p12)
}
 0x15b   : > { %882 = dma.vmem_to_hbm [thread:$0]  (%p1490_p13), %s699_s27, 32, %s1441_s30, %s682_s9  }
 0x15c PF: > { %s718_s19 = sand.u32 1, %s1009_s12   ;;  %p1491_p4 = scmp.ne.s32.totalorder %s1487_s25, 0 }
 0x15d   : > { %p1492_p5 = scmp.ge.s32.totalorder %s1021_s15, 2  ;;  %s719_s20 = scalar_lea.sflag [#allocation4], %s718_s19 }
 0x15f   : > { %p889_p7 = pnand %p1492_p5, %p1491_p4 }
 0x161   : > { %p890_p8 = pneg %p889_p7 }
 0x163   : > { %1004 = dma.done.wait (%p890_p8), %s719_s20, 32  }
 0x164   : > { %1006 = vsyncadd (%p890_p8), %s719_s20, 4294967264  ;;  %p17_p10 = scmp.ge.s32.totalorder %s1072_s18, 4   ;;  %s1493_s12 = smov %s1013_s13 }
 0x165   : > { %s1494_s13 = smov %s1017_s14  ;;  %s1495_s14 = smov %s1084_s21 }
 0x166   : > { %s1496_s15 = smov %s1072_s18  ;;  %19 = sbr.rel (!%p17_p10) target bundleno = 5 (0x5), region = 85 }
 0x16b   :  { %724 = vsyncpa [#allocation3], 1 }
 0x16c   :  { %726 = vsyncpa [#allocation3 + $0x1], 1 }
 0x16d   :  { %727 = vsyncpa [#allocation4], 1 }
 0x16e   :  { %729 = vsyncpa [#allocation4 + $0x1], 1 }

</bundles_post_ra>
